<compile_context>
chip_gen: v6e
topology: v6e:2x2x1
jax: 0.10.0
libtpu: 0.0.40
codegen_flags: <defaults>
</compile_context>

<pallas_src>
import functools

import jax
import jax.numpy as jnp
import numpy as np
from jax.experimental import pallas as pl
from jax.experimental.pallas import tpu as pltpu


def _round_up(x, m):
    return (x + m - 1) // m * m


def _cdiv(a, b):
    return -(-a // b)


def _attention_kernel(feat_ref, mem_ref, w_enc_ref, w_dec_ref, b_ed_ref,
                      w_attn_ref, b_attn_ref, attn_w_ref, weighted_ref):
    feat = feat_ref[...]                          # (TB, ft_dim), native dtype
    mem = mem_ref[...]                            # (TB, rnn_dim)

    # enc_attn(feature) + dec_attn(memory): two MXU dots, f32 accumulation,
    # fused (b_enc + b_dec) bias, ReLU.
    acc = jnp.dot(feat, w_enc_ref[...], preferred_element_type=jnp.float32)
    acc = acc + jnp.dot(mem, w_dec_ref[...], preferred_element_type=jnp.float32)
    hidden = jnp.maximum(acc + b_ed_ref[...].astype(jnp.float32), 0.0)

    # Final projection back to ft_dim (unpadded N -> no softmax masking needed;
    # padded attn rows of W_attn are zero so they contribute nothing).
    logits = (jnp.dot(hidden.astype(w_attn_ref.dtype), w_attn_ref[...],
                      preferred_element_type=jnp.float32)
              + b_attn_ref[...].astype(jnp.float32))

    # Numerically-stable softmax over the feature axis.
    m = jnp.max(logits, axis=1, keepdims=True)
    e = jnp.exp(logits - m)
    denom = jnp.sum(e, axis=1, keepdims=True)
    attn_w = e * pl.reciprocal(denom, approx=True)   # EUP vrcp: own slot, ~free

    attn_w_ref[...] = attn_w.astype(attn_w_ref.dtype)
    weighted_ref[...] = (feat.astype(jnp.float32) * attn_w).astype(weighted_ref.dtype)


def prepare_params(params, dtype=None):
    """Host-side, one-time weight prep.

    Pads only the attn axis to a lane-dense multiple of 128 and fuses the two
    biases (b_enc + b_dec).  Weights are stored (in_dim, out_dim); biases
    (1, out_dim).  Pass dtype=jnp.bfloat16 to halve weight/input HBM traffic.
    Returns (w_enc, w_dec, b_encdec, w_attn, b_attn).
    """
    w_enc, b_enc, w_dec, b_dec, w_attn, b_attn = params
    ft_dim, attn_dim = w_enc.shape
    rnn_dim = w_dec.shape[0]
    attn_pad = _round_up(attn_dim, 128)
    if dtype is None:
        dtype = w_enc.dtype

    w_enc_p = jnp.zeros((ft_dim, attn_pad), dtype).at[:, :attn_dim].set(
        w_enc.astype(dtype))
    w_dec_p = jnp.zeros((rnn_dim, attn_pad), dtype).at[:, :attn_dim].set(
        w_dec.astype(dtype))
    b_ed = jnp.zeros((1, attn_pad), dtype).at[:, :attn_dim].set(
        (b_enc + b_dec).astype(dtype))
    w_attn_p = jnp.zeros((attn_pad, ft_dim), dtype).at[:attn_dim, :].set(
        w_attn.astype(dtype))
    b_attn_p = b_attn.astype(dtype).reshape(1, ft_dim)
    return (w_enc_p, w_dec_p, b_ed, w_attn_p, b_attn_p)


def attention_forward(feature, memory, prepared, *, block_b=1024,
                      vmem_limit_bytes=48 * 1024 * 1024):
    """feature: (B, ft_dim), memory: (B, rnn_dim).

    `prepared` comes from prepare_params().  Returns (attn_weights,
    weighted_feature), both (B, ft_dim) in the prepared compute dtype.
    """
    B, ft_dim = feature.shape
    _, rnn_dim = memory.shape
    w_enc_p, w_dec_p, b_ed, w_attn_p, b_attn_p = prepared
    attn_pad = w_enc_p.shape[1]
    compute_dtype = w_enc_p.dtype

    feature = feature.astype(compute_dtype)
    memory = memory.astype(compute_dtype)

    # Batch tile: avoid pathological padding (pad < 8 rows per block) and
    # guarantee >= 2 grid steps when B > 8 so v7x's two TCs both get work.
    nb = max(1, _cdiv(B, block_b))
    if nb == 1 and B > 8:
        nb = 2
    tb = _round_up(_cdiv(B, nb), 8)
    b_pad = _round_up(B, tb)
    nb = b_pad // tb

    if b_pad != B:
        feature = jnp.pad(feature, ((0, b_pad - B), (0, 0)))
        memory = jnp.pad(memory, ((0, b_pad - B), (0, 0)))

    row = lambda i: (i, 0)       # blocked along batch
    const = lambda i: (0, 0)     # VMEM-resident across the whole grid

    attn_w, weighted = pl.pallas_call(
        _attention_kernel,
        out_shape=(jax.ShapeDtypeStruct((b_pad, ft_dim), compute_dtype),
                   jax.ShapeDtypeStruct((b_pad, ft_dim), compute_dtype)),
        grid=(nb,),
        in_specs=[
            pl.BlockSpec((tb, ft_dim), row),          # feature (unpadded width)
            pl.BlockSpec((tb, rnn_dim), row),         # memory  (unpadded width)
            pl.BlockSpec((ft_dim, attn_pad), const),  # W_enc
            pl.BlockSpec((rnn_dim, attn_pad), const), # W_dec
            pl.BlockSpec((1, attn_pad), const),       # b_enc + b_dec
            pl.BlockSpec((attn_pad, ft_dim), const),  # W_attn
            pl.BlockSpec((1, ft_dim), const),         # b_attn
        ],
        out_specs=(pl.BlockSpec((tb, ft_dim), row),
                   pl.BlockSpec((tb, ft_dim), row)),
        compiler_params=pltpu.CompilerParams(
            dimension_semantics=("parallel",),
            vmem_limit_bytes=vmem_limit_bytes),
    )(feature, memory, w_enc_p, w_dec_p, b_ed, w_attn_p, b_attn_p)

    if b_pad != B:
        attn_w = attn_w[:B]
        weighted = weighted[:B]
    return attn_w, weighted


def init_params(key, ft_dim, rnn_dim, attn_dim, dtype=jnp.float32):
    """Deterministic init mimicking nn.Linear (uniform +/- 1/sqrt(fan_in)).
    Weights stored as (in_dim, out_dim); biases as (1, out_dim)."""
    ks = jax.random.split(key, 6)

    def lin(kw, kb, fan_in, fan_out):
        bound = 1.0 / np.sqrt(fan_in)
        w = jax.random.uniform(kw, (fan_in, fan_out), dtype, -bound, bound)
        b = jax.random.uniform(kb, (1, fan_out), dtype, -bound, bound)
        return w, b

    w_enc, b_enc = lin(ks[0], ks[1], ft_dim, attn_dim)    # enc_attn
    w_dec, b_dec = lin(ks[2], ks[3], rnn_dim, attn_dim)   # dec_attn
    w_attn, b_attn = lin(ks[4], ks[5], attn_dim, ft_dim)  # attn
    return (w_enc, b_enc, w_dec, b_dec, w_attn, b_attn)


def _reference(feature, memory, params):
    w_enc, b_enc, w_dec, b_dec, w_attn, b_attn = params
    enc = feature @ w_enc + b_enc
    dec = memory @ w_dec + b_dec
    logits = jnp.maximum(enc + dec, 0.0) @ w_attn + b_attn
    aw = jax.nn.softmax(logits, axis=1)
    return aw, feature * aw


if __name__ == "__main__":
    B, ft_dim, rnn_dim, attn_dim = 2, 32, 16, 24

    key = jax.random.PRNGKey(0)
    k_feat, k_mem, k_params = jax.random.split(key, 3)

    feature = jax.random.normal(k_feat, (B, ft_dim), jnp.float32)
    memory = jax.random.normal(k_mem, (B, rnn_dim), jnp.float32)
    params = init_params(k_params, ft_dim, rnn_dim, attn_dim)

    ref_aw, ref_wf = _reference(feature, memory, params)

    # f32 path: strict check (approx reciprocal -> slightly loose tolerance).
    prepared_f32 = prepare_params(params, dtype=jnp.float32)
    fwd_f32 = jax.jit(functools.partial(attention_forward, prepared=prepared_f32))
    aw_f32, wf_f32 = fwd_f32(feature, memory)
    jax.block_until_ready((aw_f32, wf_f32))
    np.testing.assert_allclose(np.asarray(aw_f32), np.asarray(ref_aw),
                               rtol=2e-3, atol=5e-5)
    np.testing.assert_allclose(np.asarray(wf_f32), np.asarray(ref_wf),
                               rtol=2e-3, atol=5e-5)

    # bf16 operand path (half the HBM traffic): loose sanity check only.
    prepared_bf16 = prepare_params(params, dtype=jnp.bfloat16)
    fwd_bf16 = jax.jit(functools.partial(attention_forward, prepared=prepared_bf16))
    aw_bf16, wf_bf16 = fwd_bf16(feature, memory)
    jax.block_until_ready((aw_bf16, wf_bf16))
    np.testing.assert_allclose(np.asarray(aw_bf16, dtype=np.float32),
                               np.asarray(ref_aw), rtol=5e-2, atol=5e-3)
    np.testing.assert_allclose(np.asarray(wf_bf16, dtype=np.float32),
                               np.asarray(ref_wf), rtol=5e-2, atol=5e-3)

    print("KERNEL_OK")
</pallas_src>

<mosaic_0001>
module attributes {stable_mosaic.version = 11 : i64} {
  func.func @_attention_kernel(%arg0: i32, %arg1: memref<8x32xf32, #tpu.memory_space<vmem>>, %arg2: memref<8x16xf32, #tpu.memory_space<vmem>>, %arg3: memref<32x128xf32, #tpu.memory_space<vmem>>, %arg4: memref<16x128xf32, #tpu.memory_space<vmem>>, %arg5: memref<1x128xf32, #tpu.memory_space<vmem>>, %arg6: memref<128x32xf32, #tpu.memory_space<vmem>>, %arg7: memref<1x32xf32, #tpu.memory_space<vmem>>, %arg8: memref<8x32xf32, #tpu.memory_space<vmem>>, %arg9: memref<8x32xf32, #tpu.memory_space<vmem>>) attributes {dimension_semantics = [#tpu.dimension_semantics<parallel>], iteration_bounds = array<i64: 1>, scalar_prefetch = 0 : i64, scratch_operands = 0 : i64, tpu.core_type = #tpu.core_type<tc>, window_params = [{transform_indices = @transform_0, window_bounds = array<i64: 8, 32>}, {transform_indices = @transform_1, window_bounds = array<i64: 8, 16>}, {pipeline_mode = #tpu.pipeline_mode<synchronous>, transform_indices = @transform_2, window_bounds = array<i64: 32, 128>}, {pipeline_mode = #tpu.pipeline_mode<synchronous>, transform_indices = @transform_3, window_bounds = array<i64: 16, 128>}, {pipeline_mode = #tpu.pipeline_mode<synchronous>, transform_indices = @transform_4, window_bounds = array<i64: 1, 128>}, {pipeline_mode = #tpu.pipeline_mode<synchronous>, transform_indices = @transform_5, window_bounds = array<i64: 128, 32>}, {pipeline_mode = #tpu.pipeline_mode<synchronous>, transform_indices = @transform_6, window_bounds = array<i64: 1, 32>}, {transform_indices = @transform_7, window_bounds = array<i64: 8, 32>}, {transform_indices = @transform_8, window_bounds = array<i64: 8, 32>}]} {
    %c0 = arith.constant 0 : index
    %c0_0 = arith.constant 0 : index
    %0 = vector.load %arg1[%c0, %c0_0] : memref<8x32xf32, #tpu.memory_space<vmem>>, vector<8x32xf32>
    %c0_1 = arith.constant 0 : index
    %c0_2 = arith.constant 0 : index
    %1 = vector.load %arg2[%c0_1, %c0_2] : memref<8x16xf32, #tpu.memory_space<vmem>>, vector<8x16xf32>
    %c0_3 = arith.constant 0 : index
    %c0_4 = arith.constant 0 : index
    %2 = vector.load %arg3[%c0_3, %c0_4] : memref<32x128xf32, #tpu.memory_space<vmem>>, vector<32x128xf32>
    %cst = arith.constant dense<0.000000e+00> : vector<8x128xf32>
    %3 = tpu.matmul %0, %2, %cst {dimension_numbers = #tpu.dot_dimension_numbers<[1], [0], [0], [1], [0, 0, 1, 1], [], []>} : vector<8x32xf32>, vector<32x128xf32>, vector<8x128xf32> -> vector<8x128xf32>
    %c0_5 = arith.constant 0 : index
    %c0_6 = arith.constant 0 : index
    %4 = vector.load %arg4[%c0_5, %c0_6] : memref<16x128xf32, #tpu.memory_space<vmem>>, vector<16x128xf32>
    %cst_7 = arith.constant dense<0.000000e+00> : vector<8x128xf32>
    %5 = tpu.matmul %1, %4, %cst_7 {dimension_numbers = #tpu.dot_dimension_numbers<[1], [0], [0], [1], [0, 0, 1, 1], [], []>} : vector<8x16xf32>, vector<16x128xf32>, vector<8x128xf32> -> vector<8x128xf32>
    %6 = arith.addf %3, %5 : vector<8x128xf32>
    %c0_8 = arith.constant 0 : index
    %c0_9 = arith.constant 0 : index
    %7 = vector.load %arg5[%c0_8, %c0_9] : memref<1x128xf32, #tpu.memory_space<vmem>>, vector<1x128xf32>
    %8 = vector.broadcast %7 : vector<1x128xf32> to vector<8x128xf32>
    %9 = arith.addf %6, %8 : vector<8x128xf32>
    %cst_10 = arith.constant 0.000000e+00 : f32
    %10 = vector.broadcast %cst_10 : f32 to vector<8x128xf32>
    %11 = arith.maximumf %9, %10 : vector<8x128xf32>
    %c0_11 = arith.constant 0 : index
    %c0_12 = arith.constant 0 : index
    %12 = vector.load %arg6[%c0_11, %c0_12] : memref<128x32xf32, #tpu.memory_space<vmem>>, vector<128x32xf32>
    %cst_13 = arith.constant dense<0.000000e+00> : vector<8x32xf32>
    %13 = tpu.matmul %11, %12, %cst_13 {dimension_numbers = #tpu.dot_dimension_numbers<[1], [0], [0], [1], [0, 0, 1, 1], [], []>} : vector<8x128xf32>, vector<128x32xf32>, vector<8x32xf32> -> vector<8x32xf32>
    %c0_14 = arith.constant 0 : index
    %c0_15 = arith.constant 0 : index
    %14 = vector.load %arg7[%c0_14, %c0_15] : memref<1x32xf32, #tpu.memory_space<vmem>>, vector<1x32xf32>
    %15 = vector.broadcast %14 : vector<1x32xf32> to vector<8x32xf32>
    %16 = arith.addf %13, %15 : vector<8x32xf32>
    %cst_16 = arith.constant dense<0xFF800000> : vector<8xf32>
    %17 = vector.multi_reduction <maximumf>, %16, %cst_16 [1] : vector<8x32xf32> to vector<8xf32>
    %18 = vector.shape_cast %17 : vector<8xf32> to vector<8x1xf32>
    %19 = vector.broadcast %18 : vector<8x1xf32> to vector<8x32xf32>
    %20 = arith.subf %16, %19 : vector<8x32xf32>
    %21 = math.exp %20 : vector<8x32xf32>
    %cst_17 = arith.constant dense<0.000000e+00> : vector<8xf32>
    %22 = vector.multi_reduction <add>, %21, %cst_17 [1] : vector<8x32xf32> to vector<8xf32>
    %23 = vector.shape_cast %22 : vector<8xf32> to vector<8x1xf32>
    %24 = tpu.reciprocal %23 {approx = true} : vector<8x1xf32> -> vector<8x1xf32>
    %25 = vector.broadcast %24 : vector<8x1xf32> to vector<8x32xf32>
    %26 = arith.mulf %21, %25 : vector<8x32xf32>
    %c0_18 = arith.constant 0 : index
    %c0_19 = arith.constant 0 : index
    %27 = vector.load %arg8[%c0_18, %c0_19] : memref<8x32xf32, #tpu.memory_space<vmem>>, vector<8x32xf32>
    tpu.vector_store %arg8[%c0_18, %c0_19], %26 {strides = array<i32>} : memref<8x32xf32, #tpu.memory_space<vmem>>, vector<8x32xf32>,
    %28 = arith.mulf %0, %26 : vector<8x32xf32>
    %c0_20 = arith.constant 0 : index
    %c0_21 = arith.constant 0 : index
    %29 = vector.load %arg9[%c0_20, %c0_21] : memref<8x32xf32, #tpu.memory_space<vmem>>, vector<8x32xf32>
    tpu.vector_store %arg9[%c0_20, %c0_21], %28 {strides = array<i32>} : memref<8x32xf32, #tpu.memory_space<vmem>>, vector<8x32xf32>,
    return
  }
  func.func @transform_0(%arg0: i32) -> (i32, i32) {
    %c0_i32 = arith.constant 0 : i32
    %c0_i32_0 = arith.constant 0 : i32
    return %arg0, %c0_i32 : i32, i32
  }
  func.func @transform_1(%arg0: i32) -> (i32, i32) {
    %c0_i32 = arith.constant 0 : i32
    %c0_i32_0 = arith.constant 0 : i32
    return %arg0, %c0_i32 : i32, i32
  }
  func.func @transform_2(%arg0: i32) -> (i32, i32) {
    %c0_i32 = arith.constant 0 : i32
    %c0_i32_0 = arith.constant 0 : i32
    %c0_i32_1 = arith.constant 0 : i32
    return %c0_i32, %c0_i32_0 : i32, i32
  }
  func.func @transform_3(%arg0: i32) -> (i32, i32) {
    %c0_i32 = arith.constant 0 : i32
    %c0_i32_0 = arith.constant 0 : i32
    %c0_i32_1 = arith.constant 0 : i32
    return %c0_i32, %c0_i32_0 : i32, i32
  }
  func.func @transform_4(%arg0: i32) -> (i32, i32) {
    %c0_i32 = arith.constant 0 : i32
    %c0_i32_0 = arith.constant 0 : i32
    %c0_i32_1 = arith.constant 0 : i32
    return %c0_i32, %c0_i32_0 : i32, i32
  }
  func.func @transform_5(%arg0: i32) -> (i32, i32) {
    %c0_i32 = arith.constant 0 : i32
    %c0_i32_0 = arith.constant 0 : i32
    %c0_i32_1 = arith.constant 0 : i32
    return %c0_i32, %c0_i32_0 : i32, i32
  }
  func.func @transform_6(%arg0: i32) -> (i32, i32) {
    %c0_i32 = arith.constant 0 : i32
    %c0_i32_0 = arith.constant 0 : i32
    %c0_i32_1 = arith.constant 0 : i32
    return %c0_i32, %c0_i32_0 : i32, i32
  }
  func.func @transform_7(%arg0: i32) -> (i32, i32) {
    %c0_i32 = arith.constant 0 : i32
    %c0_i32_0 = arith.constant 0 : i32
    return %arg0, %c0_i32 : i32, i32
  }
  func.func @transform_8(%arg0: i32) -> (i32, i32) {
    %c0_i32 = arith.constant 0 : i32
    %c0_i32_0 = arith.constant 0 : i32
    return %arg0, %c0_i32 : i32, i32
  }
}

</mosaic_0001>

<bundles_post_ra>
// kernel: attention_forward.1
= control target key start
LH: loop header
LB: loop body
LE: loop exit
PB: predicated region body
PF: predicated region fallthrough
CT: control target
= control target key end

     0   :  { %14 = vsyncpa [#allocation3], 0  ;;  %s592_s0 = inlined_call_operand.vmem [shape: f32[8,32], index: 0, kind: input, shape index: {}]   ;;  %s593_s1 = inlined_call_operand.vmem [shape: f32[8,16], index: 1, kind: input, shape index: {}]   ;;  %s594_s2 = inlined_call_operand.hbm [shape: f32[32,128], index: 2, kind: input, shape index: {}]   ;;  %s595_s3 = inlined_call_operand.vmem [shape: f32[16,128], index: 3, kind: input, shape index: {}]   ;;  %s596_s4 = inlined_call_operand.vmem [shape: f32[1,128], index: 4, kind: input, shape index: {}]   ;;  %s597_s5 = inlined_call_operand.hbm [shape: f32[128,32], index: 5, kind: input, shape index: {}]   ;;  %s598_s6 = inlined_call_operand.vmem [shape: f32[1,32], index: 6, kind: input, shape index: {}]   ;;  %s599_s7 = inlined_call_operand.vmem [shape: f32[8,32], index: 7, kind: output, shape index: {0}]   ;;  %s600_s8 = inlined_call_operand.vmem [shape: f32[8,32], index: 8, kind: output, shape index: {1}]  }
   0x1   :  { %15 = vsyncpa [#allocation5], 0  ;;  %s474_s27 = smov [#allocation2]  }
   0x2   :  { %s25_s28 = sshll.u32 %s474_s27, 4  ;;  %s26_s28 = int_to_ptr.vmem [resolvable:$true] %s25_s28 }
   0x3   :  { %s438_s29 = scalar_lea.vmem %s26_s28, 512  ;;  %p443_p1 = scmp.lt.s32.totalorder %s26_s28, %s26_s28 }
   0x4   :  { %p439_p0 = scmp.ne.s32.totalorder %s26_s28, %s438_s29  ;;  %p444_p2 = scmp.lt.s32.totalorder %s438_s29, %s438_s29 }
   0x6   :  { %p445_p3 = por %p444_p2, %p443_p1 }
   0x8   :  { %p446_p4 = pnand %p445_p3, %p439_p0 }
   0xa   :  { %449 = shalt.err (!%p446_p4)
}
   0xb   :  { %s475_s30 = smov 128   ;;  %s476_s9 = smov 8  }
   0xc   :  { %31 = dma.hbm_to_vmem [thread:$0]  %s594_s2, 512, %s26_s28, [#allocation3], %s475_s30, %s475_s30, %s476_s9  }
   0xd   :  { %s477_s12 = smov [#allocation4]  }
   0xe   :  { %s41_s13 = sshll.u32 %s477_s12, 4  ;;  %s42_s13 = int_to_ptr.vmem [resolvable:$true] %s41_s13 }
   0xf   :  { %s458_s14 = scalar_lea.vmem %s42_s13, 2048  ;;  %p463_p6 = scmp.lt.s32.totalorder %s42_s13, %s42_s13 }
  0x10   :  { %p459_p5 = scmp.ne.s32.totalorder %s42_s13, %s458_s14  ;;  %p464_p7 = scmp.lt.s32.totalorder %s458_s14, %s458_s14 }
  0x12   :  { %p465_p8 = por %p464_p7, %p463_p6 }
  0x14   :  { %p466_p9 = pnand %p465_p8, %p459_p5 }
  0x16   :  { %469 = shalt.err (!%p466_p9)
}
  0x17   :  { %47 = dma.hbm_to_vmem [thread:$0]  %s597_s5, 2048, %s42_s13, [#allocation5], %s475_s30, %s475_s30, %s476_s9  }
  0x18   :  { %470 = dma.done.wait [#allocation3], 512  }
  0x19   :  { %471 = vsyncadd [#allocation3], 4294966784 }
  0x1a   :  { %472 = dma.done.wait [#allocation5], 2048  }
  0x1b   :  { %473 = vsyncadd [#allocation5], 4294965248  ;;  %v478_v0 = vmov 0.0   ;;  %vm479_vm0 = vmmov 0   ;;  %v63_v1 = vld [vmem:[%s595_s3 + $0x8] sm:$0xff]  ;;  %v62_v2 = vld [vmem:[%s595_s3] sm:$0xff] }
  0x1c   :  { %367 = vmatprep.subr.mxu1 %v478_v0  ;;  %371 = vmatprep.mubr.msk.f32.mxu1 %vm479_vm0, %v478_v0  ;;  %v57_v3 = vld [vmem:[%s593_s1] sm:$0xff]  ;;  %vm64_vm1 = vcmask 130048   ;;  %v61_v4 = vld [vmem:[#allocation2 + $0x18] sm:$0xff]  ;;  %v60_v6 = vld [vmem:[#allocation2 + $0x10] sm:$0xff]  ;;  %vm138_vm2 = vcmask 261120  }
  0x1d   :  { %385 = vmatprep.subr.mxu0 %v478_v0  ;;  %417 = vmatprep.mubr.msk.f32.mxu0 %vm479_vm0, %v478_v0  ;;  %v236_v5 = vld [vmem:[#allocation4 + $0x78] sm:$0xff]  ;;  %v235_v7 = vld [vmem:[#allocation4 + $0x70] sm:$0xff]  ;;  %v59_v8 = vld [vmem:[#allocation2 + $0x8] sm:$0xff] }
  0x1e   :  { %368 = vmatpush3.msra.mxu1 %v63_v1  ;;  %386 = vmatpush3.msra.mxu0 %v236_v5  ;;  %v234_v9 = vld [vmem:[#allocation4 + $0x68] sm:$0xff]  ;;  %v58_v10 = vld [vmem:[#allocation2] sm:$0xff]  ;;  %v232_v13 = vld [vmem:[#allocation4 + $0x58] sm:$0xff] }
  0x1f   :  { %369 = vmatprep.subr.mxu1 %v478_v0  ;;  %387 = vmatprep.subr.mxu0 %v478_v0  ;;  %v233_v11 = vld [vmem:[#allocation4 + $0x60] sm:$0xff]  ;;  %v231_v14 = vld [vmem:[#allocation4 + $0x50] sm:$0xff]  ;;  %v230_v15 = vld [vmem:[#allocation4 + $0x48] sm:$0xff] }
  0x20   :  { %370 = vmatpush3.msra.mxu1 %v62_v2  ;;  %388 = vmatpush3.msra.mxu0 %v235_v7  ;;  %v557_v12 = vld [vmem:[%s592_s0] sm:$0xff]  ;;  %v228_v17 = vld [vmem:[#allocation4 + $0x38] sm:$0xff]  ;;  %v227_v18 = vld [vmem:[#allocation4 + $0x30] sm:$0xff] }
  0x21   :  { %372 = vmatmul.mubr.msk.f32.vlgmr.msra.gmra.mxu1 %vm64_vm1, %v57_v3  ;;  %374 = vmatprep.subr.mxu1 %v478_v0  ;;  %v229_v16 = vld [vmem:[#allocation4 + $0x40] sm:$0xff]  ;;  %v226_v19 = vld [vmem:[#allocation4 + $0x28] sm:$0xff]  ;;  %v224_v21 = vld [vmem:[#allocation4 + $0x18] sm:$0xff] }
  0x22   :  { %375 = vmatpush3.msra.mxu1 %v61_v4  ;;  %382 = vmatprep.mubr.msk.f32.mxu1 %vm479_vm0, %v478_v0  ;;  %v225_v20 = vld [vmem:[#allocation4 + $0x20] sm:$0xff]  ;;  %v223_v22 = vld [vmem:[#allocation4 + $0x10] sm:$0xff]  ;;  %v222_v23 = vld [vmem:[#allocation4 + $0x8] sm:$0xff] }
  0x23   :  { %376 = vmatprep.subr.mxu1 %v478_v0  ;;  %389 = vmatprep.subr.mxu0 %v478_v0  ;;  %v221_v24 = vld [vmem:[#allocation4] sm:$0xff] }
  0x24   :  { %377 = vmatpush3.msra.mxu1 %v60_v6  ;;  %390 = vmatpush3.msra.mxu0 %v234_v9  ;;  %v340_v28 = vld [vmem:[%s596_s4] ss:$0 sm:$0xff] }
  0x25   :  { %378 = vmatprep.subr.mxu1 %v478_v0  ;;  %391 = vmatprep.subr.mxu0 %v478_v0  ;;  %v341_v33 = vld [vmem:[%s598_s6] ss:$0 sm:$0xff] }
  0x26   :  { %379 = vmatpush3.msra.mxu1 %v59_v8  ;;  %392 = vmatpush3.msra.mxu0 %v233_v11 }
  0x27   :  { %380 = vmatprep.subr.mxu1 %v478_v0  ;;  %393 = vmatprep.subr.mxu0 %v478_v0 }
  0x28   :  { %381 = vmatpush3.msra.mxu1 %v58_v10  ;;  %394 = vmatpush3.msra.mxu0 %v232_v13 }
  0x29   :  { %383 = vmatmul.mubr.msk.f32.vlgmr.msra.gmra.mxu1 %vm138_vm2, %v557_v12  ;;  %395 = vmatprep.subr.mxu0 %v478_v0 }
  0x2a   :  { %396 = vmatpush3.msra.mxu0 %v231_v14 }
  0x2b   :  { %397 = vmatprep.subr.mxu0 %v478_v0 }
  0x2c   :  { %398 = vmatpush3.msra.mxu0 %v230_v15 }
  0x2d   :  { %399 = vmatprep.subr.mxu0 %v478_v0 }
  0x2e   :  { %400 = vmatpush3.msra.mxu0 %v229_v16 }
  0x2f   :  { %401 = vmatprep.subr.mxu0 %v478_v0 }
  0x30   :  { %402 = vmatpush3.msra.mxu0 %v228_v17 }
  0x31   :  { %403 = vmatprep.subr.mxu0 %v478_v0 }
  0x32   :  { %404 = vmatpush3.msra.mxu0 %v227_v18 }
  0x33   :  { %405 = vmatprep.subr.mxu0 %v478_v0 }
  0x34   :  { %406 = vmatpush3.msra.mxu0 %v226_v19 }
  0x35   :  { %407 = vmatprep.subr.mxu0 %v478_v0 }
  0x36   :  { %408 = vmatpush3.msra.mxu0 %v225_v20 }
  0x37   :  { %409 = vmatprep.subr.mxu0 %v478_v0 }
  0x38   :  { %410 = vmatpush3.msra.mxu0 %v224_v21 }
  0x39   :  { %411 = vmatprep.subr.mxu0 %v478_v0 }
  0x3a   :  { %412 = vmatpush3.msra.mxu0 %v223_v22 }
  0x3b   :  { %413 = vmatprep.subr.mxu0 %v478_v0 }
  0x3c   :  { %414 = vmatpush3.msra.mxu0 %v222_v23 }
  0x3d   :  { %415 = vmatprep.subr.mxu0 %v478_v0 }
  0x3e   :  { %416 = vmatpush3.msra.mxu0 %v221_v24 }
  0xe1   :  { %v134_v25 = vpop.f32.mrf.mxu1 }
  0xe3   :  { %v373_v26 = vpop.f32.mrf.mxu1 }
  0xe9   :  { %v208_v27 = vpop.f32.mrf.mxu1 }
  0xea   :  { %v209_v29 = vadd.f32 %v208_v27, %v134_v25 }
  0xeb   :  { %v384_v30 = vpop.f32.mrf.mxu1 }
  0xec   :  { %v219_v31 = vadd.f32 %v340_v28, %v209_v29 }
  0xee   :  { %v220_v32 = vmax.f32 %v219_v31, 0.0 }
  0xf0   :  { %418 = vmatmul.mubr.f32.vlgmr.msra.gmra.mxu0 %v220_v32 }
 0x1b0   :  { %v310_v34 = vpop.f32.mrf.mxu0 }
 0x1b1   :  { %v311_v35 = vadd.f32 %v341_v33, %v310_v34 }
 0x1b2   :  { %v419_v36 = vpop.f32.mrf.mxu0 }
 0x1b3   :  { %v314_v37 = vsel %vm138_vm2, %v311_v35, -inf }
 0x1b4   :  { %315 = vmax.xlane.f32.xlu0 %v314_v37 }
 0x23d   :  { %v316_v38 = vpop.xlane.xlu0 %315 }
 0x23e   :  { %v317_v39 = vsub.f32 %v311_v35, %v316_v38 }
 0x240   :  { %v318_v40 = vmul.f32 1.442695, %v317_v39 }
 0x242   :  { %426 = vpow2.f32 %v318_v40 }
 0x24f   :  { %v427_v41 = vpop.eup %426 }
 0x250   :  { %v320_v42 = vsel %vm138_vm2, %v427_v41, 0.0 }
 0x251   :  { %321 = vadd.xlane.f32.xlu0 %v320_v42 }
 0x2da   :  { %v322_v43 = vpop.xlane.xlu0 %321 }
 0x2db   :  { %428 = vrcp.f32 %v322_v43 }
 0x2e8   :  { %v429_v44 = vpop.eup %428 }
 0x2e9   :  { %v324_v45 = vmul.f32 %v429_v44, %v427_v41 }
 0x2eb   :  { %325 = vst.msk [vmem:[%s599_s7] sm:$0xff] %vm138_vm2, %v324_v45  ;;  %v326_v46 = vmul.f32 %v324_v45, %v557_v12 }
 0x2ed   :  { %327 = vst.msk [vmem:[%s600_s8] sm:$0xff] %vm138_vm2, %v326_v46 }
 0x2ee   :  { %336 = vsyncpa [#allocation3], 1 }
 0x2ef   :  { %337 = vsyncpa [#allocation5], 1 }

</bundles_post_ra>
